<compile_context>
chip_gen: v7x
topology: tpu7x:2x2x1
jax: 0.10.0
libtpu: 0.0.40
codegen_flags: <defaults>
</compile_context>

<pallas_src>
import jax
import jax.numpy as jnp
from jax.experimental import pallas as pl
from jax.experimental.pallas import tpu as pltpu


def _round_up(x, m):
    return ((x + m - 1) // m) * m


def _cdiv(a, b):
    return (a + b - 1) // b


def _make_mlp_kernel(num_linear):
    """Fused MLP kernel for `num_linear` Linear layers.

    Ref order: x, (w0, b0), (w1, b1), ..., out
    ReLU after every layer except the last (matches the PyTorch Sequential).
    """

    def kernel(*refs):
        x_ref = refs[0]
        o_ref = refs[-1]
        h = x_ref[...].astype(jnp.float32)
        for l in range(num_linear):
            w = refs[1 + 2 * l][...]
            b = refs[2 + 2 * l][...]
            h = jnp.dot(h, w, preferred_element_type=jnp.float32) + b
            if l < num_linear - 1:
                h = jnp.maximum(h, 0.0)
        # Dropout(p=0.5) in eval mode is the identity.
        o_ref[...] = h.astype(o_ref.dtype)

    return kernel


def init_dnn_params(key, hidden_dims, input_dim=3, output_dim=2, dtype=jnp.float32):
    """Deterministic parameter init (shapes match nn.Linear layers).

    Weight stored as [in, out] (so y = x @ W + b), bias as [1, out].
    """
    dims = [input_dim] + list(hidden_dims) + [output_dim]
    params = []
    for i in range(len(dims) - 1):
        key, kw, kb = jax.random.split(key, 3)
        fan_in, fan_out = dims[i], dims[i + 1]
        bound = 1.0 / jnp.sqrt(jnp.array(fan_in, dtype=jnp.float32))
        w = jax.random.uniform(kw, (fan_in, fan_out), dtype, -bound, bound)
        b = jax.random.uniform(kb, (1, fan_out), dtype, -bound, bound)
        params.append((w, b))
    return params


@jax.jit
def dnn_forward(x, params_flat):
    """Run the fused, batch-tiled MLP Pallas kernel.

    x           : [batch, input_dim] float32
    params_flat : flat tuple (w0, b0, w1, b1, ...), w_i [in, out], b_i [1, out]
    """
    num_linear = len(params_flat) // 2
    batch, input_dim = x.shape
    dtype = x.dtype
    itemsize = jnp.dtype(dtype).itemsize

    # True layer widths (no feature padding anywhere).
    dims = [input_dim]
    for l in range(num_linear):
        dims.append(params_flat[2 * l].shape[1])
    output_dim = dims[-1]

    # ---- Batch tiling: cap 1024 rows/step, minimize round-up waste, and keep
    # at least 2 grid steps (when batch permits) so v7x's 2 TCs both get work.
    MAX_TB = 1024
    num_tiles = _cdiv(batch, MAX_TB)
    if batch >= 16:
        num_tiles = max(num_tiles, 2)
    tb = _round_up(_cdiv(batch, num_tiles), 8)
    batch_p = _round_up(batch, tb)
    grid = (batch_p // tb,)

    # Pad only batch rows (cheap, and only when batch % tb != 0).
    x_in = x if batch_p == batch else jnp.pad(x, ((0, batch_p - batch), (0, 0)))

    kernel = _make_mlp_kernel(num_linear)

    # ---- BlockSpecs: x/out follow the batch grid index with their TRUE last
    # dims (block == full array extent on that dim); weights/biases use a
    # constant index_map so they stay VMEM-resident across grid steps.
    in_specs = [pl.BlockSpec((tb, input_dim), lambda i: (i, 0))]
    for l in range(num_linear):
        w, b = params_flat[2 * l], params_flat[2 * l + 1]
        in_specs.append(pl.BlockSpec(w.shape, lambda i: (0, 0)))
        in_specs.append(pl.BlockSpec(b.shape, lambda i: (0, 0)))

    out_shape = jax.ShapeDtypeStruct((batch_p, output_dim), dtype)
    out_spec = pl.BlockSpec((tb, output_dim), lambda i: (i, 0))

    # ---- VMEM budget: double-buffered x/out tiles + (default double-buffered)
    # resident params + intermediate activations, with headroom; stay under
    # v7x's 64 MiB physical VMEM.
    LANE, SUB = 128, 8
    vmem_need = 2 * _round_up(tb, SUB) * _round_up(input_dim, LANE) * itemsize
    vmem_need += 2 * _round_up(tb, SUB) * _round_up(output_dim, LANE) * itemsize
    for l in range(num_linear):
        fin, fout = dims[l], dims[l + 1]
        vmem_need += 2 * _round_up(fin, SUB) * _round_up(fout, LANE) * itemsize
        vmem_need += 2 * SUB * _round_up(fout, LANE) * itemsize
    vmem_need += sum(_round_up(tb, SUB) * _round_up(d, LANE) * itemsize
                     for d in dims[1:])
    vmem_limit = min(vmem_need + (4 << 20), 64 << 20)

    # ---- Cost estimate from the true (unpadded) traffic / flops.
    flops = 2 * batch_p * sum(dims[l] * dims[l + 1] for l in range(num_linear))
    param_bytes = sum(int(p.size) * p.dtype.itemsize for p in params_flat)
    bytes_accessed = (int(x_in.size) * itemsize + param_bytes
                      + batch_p * output_dim * itemsize)

    out_p = pl.pallas_call(
        kernel,
        out_shape=out_shape,
        grid_spec=pltpu.PrefetchScalarGridSpec(
            num_scalar_prefetch=0,
            grid=grid,
            in_specs=in_specs,
            out_specs=out_spec,
        ),
        compiler_params=pltpu.CompilerParams(
            dimension_semantics=("parallel",),   # megacore sharding on v7x
            vmem_limit_bytes=int(vmem_limit),
        ),
        cost_estimate=pl.CostEstimate(
            flops=int(flops), transcendentals=0,
            bytes_accessed=int(bytes_accessed)),
    )(x_in, *params_flat)

    return out_p if batch_p == batch else out_p[:batch]


def dnn_reference(x, params):
    """Pure-JAX reference for correctness checking."""
    h = x
    n = len(params)
    for i, (w, b) in enumerate(params):
        h = h @ w + b
        if i < n - 1:
            h = jnp.maximum(h, 0.0)
    return h


if __name__ == "__main__":
    # Shapes consistent with the module defaults: input_dim=3, output_dim=2.
    hidden_dims = (32, 32)
    input_dim, output_dim = 3, 2

    key = jax.random.PRNGKey(0)
    key, kp = jax.random.split(key)
    params = init_dnn_params(kp, hidden_dims, input_dim, output_dim)
    params_flat = tuple(p for wb in params for p in wb)

    # Case 1: tiny batch (single grid step, exact tile).
    key, kx = jax.random.split(key)
    x_small = jax.random.normal(kx, (8, input_dim), dtype=jnp.float32)
    out_small = jax.block_until_ready(dnn_forward(x_small, params_flat))
    ref_small = dnn_reference(x_small, params)
    assert out_small.shape == (8, output_dim), out_small.shape
    assert jnp.allclose(out_small, ref_small, atol=1e-5, rtol=1e-5)

    # Case 2: larger batch -> exercises batch tiling (grid >= 2) + row padding.
    key, kx2 = jax.random.split(key)
    x_big = jax.random.normal(kx2, (600, input_dim), dtype=jnp.float32)
    out_big = jax.block_until_ready(dnn_forward(x_big, params_flat))
    ref_big = dnn_reference(x_big, params)
    assert out_big.shape == (600, output_dim), out_big.shape
    assert jnp.allclose(out_big, ref_big, atol=1e-5, rtol=1e-5)

    print("KERNEL_OK")
</pallas_src>

<mosaic_0001>
module attributes {stable_mosaic.version = 11 : i64} {
  func.func @kernel(%arg0: i32, %arg1: memref<8x3xf32, #tpu.memory_space<vmem>>, %arg2: memref<3x32xf32, #tpu.memory_space<vmem>>, %arg3: memref<1x32xf32, #tpu.memory_space<vmem>>, %arg4: memref<32x32xf32, #tpu.memory_space<vmem>>, %arg5: memref<1x32xf32, #tpu.memory_space<vmem>>, %arg6: memref<32x2xf32, #tpu.memory_space<vmem>>, %arg7: memref<1x2xf32, #tpu.memory_space<vmem>>, %arg8: memref<8x2xf32, #tpu.memory_space<vmem>>) attributes {dimension_semantics = [#tpu.dimension_semantics<parallel>], iteration_bounds = array<i64: 1>, scalar_prefetch = 0 : i64, scratch_operands = 0 : i64, tpu.core_type = #tpu.core_type<tc>, window_params = [{transform_indices = @transform_0, window_bounds = array<i64: 8, 3>}, {pipeline_mode = #tpu.pipeline_mode<synchronous>, transform_indices = @transform_1, window_bounds = array<i64: 3, 32>}, {pipeline_mode = #tpu.pipeline_mode<synchronous>, transform_indices = @transform_2, window_bounds = array<i64: 1, 32>}, {pipeline_mode = #tpu.pipeline_mode<synchronous>, transform_indices = @transform_3, window_bounds = array<i64: 32, 32>}, {pipeline_mode = #tpu.pipeline_mode<synchronous>, transform_indices = @transform_4, window_bounds = array<i64: 1, 32>}, {pipeline_mode = #tpu.pipeline_mode<synchronous>, transform_indices = @transform_5, window_bounds = array<i64: 32, 2>}, {pipeline_mode = #tpu.pipeline_mode<synchronous>, transform_indices = @transform_6, window_bounds = array<i64: 1, 2>}, {transform_indices = @transform_7, window_bounds = array<i64: 8, 2>}]} {
    %c0 = arith.constant 0 : index
    %c0_0 = arith.constant 0 : index
    %0 = vector.load %arg1[%c0, %c0_0] : memref<8x3xf32, #tpu.memory_space<vmem>>, vector<8x3xf32>
    %c0_1 = arith.constant 0 : index
    %c0_2 = arith.constant 0 : index
    %1 = vector.load %arg2[%c0_1, %c0_2] : memref<3x32xf32, #tpu.memory_space<vmem>>, vector<3x32xf32>
    %c0_3 = arith.constant 0 : index
    %c0_4 = arith.constant 0 : index
    %2 = vector.load %arg3[%c0_3, %c0_4] : memref<1x32xf32, #tpu.memory_space<vmem>>, vector<1x32xf32>
    %cst = arith.constant dense<0.000000e+00> : vector<8x32xf32>
    %3 = tpu.matmul %0, %1, %cst {dimension_numbers = #tpu.dot_dimension_numbers<[1], [0], [0], [1], [0, 0, 1, 1], [], []>} : vector<8x3xf32>, vector<3x32xf32>, vector<8x32xf32> -> vector<8x32xf32>
    %4 = vector.broadcast %2 : vector<1x32xf32> to vector<8x32xf32>
    %5 = arith.addf %3, %4 : vector<8x32xf32>
    %cst_5 = arith.constant 0.000000e+00 : f32
    %6 = vector.broadcast %cst_5 : f32 to vector<8x32xf32>
    %7 = arith.maximumf %5, %6 : vector<8x32xf32>
    %c0_6 = arith.constant 0 : index
    %c0_7 = arith.constant 0 : index
    %8 = vector.load %arg4[%c0_6, %c0_7] : memref<32x32xf32, #tpu.memory_space<vmem>>, vector<32x32xf32>
    %c0_8 = arith.constant 0 : index
    %c0_9 = arith.constant 0 : index
    %9 = vector.load %arg5[%c0_8, %c0_9] : memref<1x32xf32, #tpu.memory_space<vmem>>, vector<1x32xf32>
    %cst_10 = arith.constant dense<0.000000e+00> : vector<8x32xf32>
    %10 = tpu.matmul %7, %8, %cst_10 {dimension_numbers = #tpu.dot_dimension_numbers<[1], [0], [0], [1], [0, 0, 1, 1], [], []>} : vector<8x32xf32>, vector<32x32xf32>, vector<8x32xf32> -> vector<8x32xf32>
    %11 = vector.broadcast %9 : vector<1x32xf32> to vector<8x32xf32>
    %12 = arith.addf %10, %11 : vector<8x32xf32>
    %cst_11 = arith.constant 0.000000e+00 : f32
    %13 = vector.broadcast %cst_11 : f32 to vector<8x32xf32>
    %14 = arith.maximumf %12, %13 : vector<8x32xf32>
    %c0_12 = arith.constant 0 : index
    %c0_13 = arith.constant 0 : index
    %15 = vector.load %arg6[%c0_12, %c0_13] : memref<32x2xf32, #tpu.memory_space<vmem>>, vector<32x2xf32>
    %c0_14 = arith.constant 0 : index
    %c0_15 = arith.constant 0 : index
    %16 = vector.load %arg7[%c0_14, %c0_15] : memref<1x2xf32, #tpu.memory_space<vmem>>, vector<1x2xf32>
    %cst_16 = arith.constant dense<0.000000e+00> : vector<8x2xf32>
    %17 = tpu.matmul %14, %15, %cst_16 {dimension_numbers = #tpu.dot_dimension_numbers<[1], [0], [0], [1], [0, 0, 1, 1], [], []>} : vector<8x32xf32>, vector<32x2xf32>, vector<8x2xf32> -> vector<8x2xf32>
    %18 = vector.broadcast %16 : vector<1x2xf32> to vector<8x2xf32>
    %19 = arith.addf %17, %18 : vector<8x2xf32>
    %c0_17 = arith.constant 0 : index
    %c0_18 = arith.constant 0 : index
    %20 = vector.load %arg8[%c0_17, %c0_18] : memref<8x2xf32, #tpu.memory_space<vmem>>, vector<8x2xf32>
    tpu.vector_store %arg8[%c0_17, %c0_18], %19 {strides = array<i32>} : memref<8x2xf32, #tpu.memory_space<vmem>>, vector<8x2xf32>,
    return
  }
  func.func @transform_0(%arg0: i32) -> (i32, i32) {
    %c0_i32 = arith.constant 0 : i32
    %c0_i32_0 = arith.constant 0 : i32
    return %arg0, %c0_i32 : i32, i32
  }
  func.func @transform_1(%arg0: i32) -> (i32, i32) {
    %c0_i32 = arith.constant 0 : i32
    %c0_i32_0 = arith.constant 0 : i32
    %c0_i32_1 = arith.constant 0 : i32
    return %c0_i32, %c0_i32_0 : i32, i32
  }
  func.func @transform_2(%arg0: i32) -> (i32, i32) {
    %c0_i32 = arith.constant 0 : i32
    %c0_i32_0 = arith.constant 0 : i32
    %c0_i32_1 = arith.constant 0 : i32
    return %c0_i32, %c0_i32_0 : i32, i32
  }
  func.func @transform_3(%arg0: i32) -> (i32, i32) {
    %c0_i32 = arith.constant 0 : i32
    %c0_i32_0 = arith.constant 0 : i32
    %c0_i32_1 = arith.constant 0 : i32
    return %c0_i32, %c0_i32_0 : i32, i32
  }
  func.func @transform_4(%arg0: i32) -> (i32, i32) {
    %c0_i32 = arith.constant 0 : i32
    %c0_i32_0 = arith.constant 0 : i32
    %c0_i32_1 = arith.constant 0 : i32
    return %c0_i32, %c0_i32_0 : i32, i32
  }
  func.func @transform_5(%arg0: i32) -> (i32, i32) {
    %c0_i32 = arith.constant 0 : i32
    %c0_i32_0 = arith.constant 0 : i32
    %c0_i32_1 = arith.constant 0 : i32
    return %c0_i32, %c0_i32_0 : i32, i32
  }
  func.func @transform_6(%arg0: i32) -> (i32, i32) {
    %c0_i32 = arith.constant 0 : i32
    %c0_i32_0 = arith.constant 0 : i32
    %c0_i32_1 = arith.constant 0 : i32
    return %c0_i32, %c0_i32_0 : i32, i32
  }
  func.func @transform_7(%arg0: i32) -> (i32, i32) {
    %c0_i32 = arith.constant 0 : i32
    %c0_i32_0 = arith.constant 0 : i32
    return %arg0, %c0_i32 : i32, i32
  }
}

</mosaic_0001>

<bundles_post_ra>
// kernel: dnn_forward.1
= control target key start
LH: loop header
LB: loop body
LE: loop exit
PB: predicated region body
PF: predicated region fallthrough
CT: control target
= control target key end

     0   :  { %vm39_vm0 = vcmask 1042432   ;;  %vm35_vm1 = vcmask 23552   ;;  %v351_v0 = vmov 0.0   ;;  %vm352_vm2 = vmmov 0   ;;  %s436_s1 = inlined_call_operand.vmem [shape: f32[3,32], index: 1, kind: input, shape index: {}]   ;;  %s437_s0 = inlined_call_operand.vmem [shape: f32[8,3], index: 0, kind: input, shape index: {}]   ;;  %s438_s3 = inlined_call_operand.vmem [shape: f32[32,32], index: 3, kind: input, shape index: {}]   ;;  %s439_s5 = inlined_call_operand.vmem [shape: f32[32,2], index: 5, kind: input, shape index: {}]   ;;  %s440_s2 = inlined_call_operand.vmem [shape: f32[1,32], index: 2, kind: input, shape index: {}]   ;;  %s441_s4 = inlined_call_operand.vmem [shape: f32[1,32], index: 4, kind: input, shape index: {}]   ;;  %s442_s6 = inlined_call_operand.vmem [shape: f32[1,2], index: 6, kind: input, shape index: {}]   ;;  %s443_s7 = inlined_call_operand.vmem [shape: f32[8,2], index: 7, kind: output, shape index: {}]  }
   0x1   :  { %309 = vmatprep.subr.mxu0 %v351_v0  ;;  %v27_v1 = vld [vmem:[%s436_s1] sm:$0x7]  ;;  %311 = vmatprep.mubr.msk.f32.mxu0 %vm352_vm2, %v351_v0  ;;  %v353_v4 = vmov 0.0|0.0   ;;  %v115_v5 = vld [vmem:[%s438_s3 + $0x8] sm:$0xff]  ;;  %v116_v7 = vld [vmem:[%s438_s3 + $0x10] sm:$0xff]  ;;  %vm125_vm3 = vcmask 261120  }
   0x2   :  { %v26_v2 = vld [vmem:[%s437_s0] sm:$0xff]  ;;  %310 = vmatpush3.msk.msra.mxu0 %vm39_vm0, %v27_v1  ;;  %336 = vmatprep.subr.bf16.mxu1 %v353_v4  ;;  %v117_v8 = vld [vmem:[%s438_s3 + $0x18] sm:$0xff]  ;;  %v201_v11 = vld [vmem:[%s439_s5 + $0x8] sm:$0xff]  ;;  %vm284_vm4 = vcmask 15360  }
   0x3   :  { %v114_v3 = vld [vmem:[%s438_s3] sm:$0xff]  ;;  %312 = vmatmul.mubr.msk.f32.vlgmr.msra.gmra.mrb[0].mxu0 %vm35_vm1, %v26_v2  ;;  %322 = vmatprep.mubr.msk.f32.mxu1 %vm352_vm2, %v351_v0  ;;  %v340_v9 = vpack.c.bf16 %v117_v8, %v116_v7  ;;  %v202_v18 = vld [vmem:[%s439_s5 + $0x10] sm:$0xff]  ;;  %v203_v19 = vld [vmem:[%s439_s5 + $0x18] sm:$0xff] }
   0x4   :  { %v337_v6 = vpack.c.bf16 %v115_v5, %v114_v3  ;;  %342 = vmatprep.subr.bf16.mxu0 %v353_v4  ;;  %333 = vmatprep.mubr.msk.f32.mxu0 %vm352_vm2, %v351_v0  ;;  %v200_v10 = vld [vmem:[%s439_s5] sm:$0xff]  ;;  %v346_v20 = vpack.c.bf16 %v203_v19, %v202_v18 }
   0x5   :  { %v343_v12 = vpack.c.bf16 %v201_v11, %v200_v10  ;;  %v290_v13 = vld [vmem:[%s440_s2] ss:$0 sm:$0xff] }
   0x6   :  { %338 = vmatpush3.bf16.msra.mxu1 %v337_v6  ;;  %v293_v21 = vld [vmem:[%s441_s4] ss:$0 sm:$0xff] }
   0x7   :  { %339 = vmatprep.subr.bf16.mxu1 %v353_v4  ;;  %344 = vmatpush3.bf16.msra.mxu0 %v343_v12  ;;  %v295_v26 = vld [vmem:[%s442_s6] ss:$0 sm:$0xff] }
   0x8   :  { %345 = vmatprep.subr.bf16.mxu0 %v353_v4 }
   0xa   :  { %341 = vmatpush3.bf16.msra.mxu1 %v340_v9 }
   0xb   :  { %347 = vmatpush3.bf16.msra.mxu0 %v346_v20 }
  0xd6   :  { %v109_v14 = vpop.f32.mrb[0].mxu0 }
  0xd7   :  { %v110_v15 = vadd.f32 %v290_v13, %v109_v14  ;;  %v313_v16 = vpop.f32.mrb[1].mxu0 }
  0xd9   :  { %v113_v17 = vmax.f32 %v110_v15, 0.0 }
  0xdb   :  { %323 = vmatmul.mubr.msk.f32.vlgmr.msra.gmra.mrb[0].mxu1 %vm125_vm3, %v113_v17 }
 0x1ae   :  { %v195_v22 = vpop.f32.mrb[0].mxu1 }
 0x1af   :  { %v196_v23 = vadd.f32 %v293_v21, %v195_v22  ;;  %v324_v24 = vpop.f32.mrb[1].mxu1 }
 0x1b1   :  { %v199_v25 = vmax.f32 %v196_v23, 0.0 }
 0x1b3   :  { %334 = vmatmul.mubr.msk.f32.vlgmr.msra.gmra.mrb[2].mxu0 %vm125_vm3, %v199_v25 }
 0x286   :  { %v280_v27 = vpop.f32.mrb[2].mxu0 }
 0x287   :  { %v281_v28 = vadd.f32 %v295_v26, %v280_v27  ;;  %v335_v29 = vpop.f32.mrb[3].mxu0 }
 0x289   :  { %285 = vst.msk [vmem:[%s443_s7] sm:$0xff] %vm284_vm4, %v281_v28 }

</bundles_post_ra>
